<compile_context>
chip_gen: v5e
topology: v5e:2x2
jax: 0.10.0
libtpu: 0.0.40
codegen_flags: <defaults>
</compile_context>

<pallas_src>
import jax
import jax.numpy as jnp
from jax.experimental import pallas as pl
from jax.experimental.pallas import tpu as pltpu

LANE = 128
SUBLANE = 8


def _round_up(n, m):
    return ((n + m - 1) // m) * m


def _dqn_kernel(x_ref, w1_ref, b1_ref, w2_ref, b2_ref, w3_ref, b3_ref, o_ref):
    # x tile: [TILE_B, I] f32.  Weights are resident bf16 (MXU-native); biases f32.
    # All matmuls accumulate in f32 on the MXU; elementwise work stays f32.
    x = x_ref[...].astype(jnp.bfloat16)

    h1 = jnp.dot(x, w1_ref[...], preferred_element_type=jnp.float32) + b1_ref[...]
    h1 = jnp.maximum(h1, 0.0)

    h2 = jnp.dot(h1.astype(jnp.bfloat16), w2_ref[...],
                 preferred_element_type=jnp.float32) + b2_ref[...]
    h2 = jnp.maximum(h2, 0.0)

    # final layer is padded to a lane-dense width (128) -> unmasked vector stores
    o_ref[...] = (jnp.dot(h2.astype(jnp.bfloat16), w3_ref[...],
                          preferred_element_type=jnp.float32)
                  + b3_ref[...]).astype(o_ref.dtype)


def dqn_forward(x, params):
    """x: [B, ...] (flattened to [B, input_size]).  Returns [B, output_size] f32."""
    x = x.reshape(x.shape[0], -1).astype(jnp.float32)
    w1, b1 = params["w1"], params["b1"]
    w2, b2 = params["w2"], params["b2"]
    w3, b3 = params["w3"], params["b3"]          # already lane-padded to out_pad
    out_size = params["out_size"]
    out_pad = w3.shape[1]

    B, I = x.shape
    tile_b = min(512, _round_up(B, SUBLANE))     # 256-512 rows at large B, >=8 always
    b_pad = _round_up(B, tile_b)
    if b_pad != B:
        x = jnp.pad(x, ((0, b_pad - B), (0, 0)))
    grid = (b_pad // tile_b,)

    def resident(a):                              # weights/biases: fetched once, stay in VMEM
        return pl.BlockSpec(a.shape, lambda i: (0, 0))

    out = pl.pallas_call(
        _dqn_kernel,
        out_shape=jax.ShapeDtypeStruct((b_pad, out_pad), jnp.float32),
        grid=grid,
        in_specs=[
            pl.BlockSpec((tile_b, I), lambda i: (i, 0)),   # x: batch-tiled, auto double-buffered
            resident(w1), resident(b1),
            resident(w2), resident(b2),
            resident(w3), resident(b3),
        ],
        out_specs=pl.BlockSpec((tile_b, out_pad), lambda i: (i, 0)),
        compiler_params=pltpu.CompilerParams(
            dimension_semantics=("parallel",)),            # v7x: shard batch tiles over both TCs
    )(x, w1, b1, w2, b2, w3, b3)

    return out[:B, :out_size]


def init_dqn_params(key, input_size, hidden_size, output_size=2):
    """Mirrors nn.Linear init U(-1/sqrt(fan_in), 1/sqrt(fan_in)).
    Weights stored [in, out] (transposed vs. PyTorch) in bf16; biases [1, out] in f32.
    Final layer zero-padded to a lane-dense width (multiple of 128)."""
    ks = jax.random.split(key, 6)

    def linear(kw, kb, fan_in, fan_out):
        bound = 1.0 / jnp.sqrt(jnp.float32(fan_in))
        w = jax.random.uniform(kw, (fan_in, fan_out), jnp.float32, -bound, bound)
        b = jax.random.uniform(kb, (1, fan_out), jnp.float32, -bound, bound)
        return w, b

    w1, b1 = linear(ks[0], ks[1], input_size, hidden_size)
    w2, b2 = linear(ks[2], ks[3], hidden_size, hidden_size)
    w3, b3 = linear(ks[4], ks[5], hidden_size, output_size)

    out_pad = _round_up(max(output_size, LANE), LANE)
    w3 = jnp.pad(w3, ((0, 0), (0, out_pad - output_size)))
    b3 = jnp.pad(b3, ((0, 0), (0, out_pad - output_size)))

    return {
        "w1": w1.astype(jnp.bfloat16), "b1": b1,
        "w2": w2.astype(jnp.bfloat16), "b2": b2,
        "w3": w3.astype(jnp.bfloat16), "b3": b3,
        "out_size": output_size,
    }


def dqn_reference(x, params):
    """Pure-JAX reference with the same math as the kernel (bf16 dot inputs, f32 acc)."""
    x = x.reshape(x.shape[0], -1).astype(jnp.float32)

    def lin(a, w, b):
        return jnp.dot(a.astype(jnp.bfloat16), w,
                       preferred_element_type=jnp.float32) + b

    h1 = jnp.maximum(lin(x, params["w1"], params["b1"]), 0.0)
    h2 = jnp.maximum(lin(h1, params["w2"], params["b2"]), 0.0)
    out = lin(h2, params["w3"], params["b3"])
    return out[:, :params["out_size"]]


if __name__ == "__main__":
    batch, input_size, hidden_size, output_size = 2, 16, 32, 2

    key = jax.random.PRNGKey(0)
    kx, kp = jax.random.split(key)
    x = jax.random.normal(kx, (batch, input_size), jnp.float32)
    params = init_dqn_params(kp, input_size, hidden_size, output_size)

    out = jax.block_until_ready(dqn_forward(x, params))
    ref = dqn_reference(x, params)

    assert out.shape == (batch, output_size), out.shape
    assert jnp.allclose(out, ref, atol=1e-4, rtol=1e-4), (out, ref)

    print("KERNEL_OK")
</pallas_src>

<mosaic_0001>
module attributes {stable_mosaic.version = 11 : i64} {
  func.func @_dqn_kernel(%arg0: i32, %arg1: memref<8x16xf32, #tpu.memory_space<vmem>>, %arg2: memref<16x32xbf16, #tpu.memory_space<vmem>>, %arg3: memref<1x32xf32, #tpu.memory_space<vmem>>, %arg4: memref<32x32xbf16, #tpu.memory_space<vmem>>, %arg5: memref<1x32xf32, #tpu.memory_space<vmem>>, %arg6: memref<32x128xbf16, #tpu.memory_space<vmem>>, %arg7: memref<1x128xf32, #tpu.memory_space<vmem>>, %arg8: memref<8x128xf32, #tpu.memory_space<vmem>>) attributes {dimension_semantics = [#tpu.dimension_semantics<parallel>], iteration_bounds = array<i64: 1>, scalar_prefetch = 0 : i64, scratch_operands = 0 : i64, tpu.core_type = #tpu.core_type<tc>, window_params = [{transform_indices = @transform_0, window_bounds = array<i64: 8, 16>}, {pipeline_mode = #tpu.pipeline_mode<synchronous>, transform_indices = @transform_1, window_bounds = array<i64: 16, 32>}, {pipeline_mode = #tpu.pipeline_mode<synchronous>, transform_indices = @transform_2, window_bounds = array<i64: 1, 32>}, {pipeline_mode = #tpu.pipeline_mode<synchronous>, transform_indices = @transform_3, window_bounds = array<i64: 32, 32>}, {pipeline_mode = #tpu.pipeline_mode<synchronous>, transform_indices = @transform_4, window_bounds = array<i64: 1, 32>}, {pipeline_mode = #tpu.pipeline_mode<synchronous>, transform_indices = @transform_5, window_bounds = array<i64: 32, 128>}, {pipeline_mode = #tpu.pipeline_mode<synchronous>, transform_indices = @transform_6, window_bounds = array<i64: 1, 128>}, {transform_indices = @transform_7, window_bounds = array<i64: 8, 128>}]} {
    %c0 = arith.constant 0 : index
    %c0_0 = arith.constant 0 : index
    %0 = vector.load %arg1[%c0, %c0_0] : memref<8x16xf32, #tpu.memory_space<vmem>>, vector<8x16xf32>
    %1 = arith.truncf %0 : vector<8x16xf32> to vector<8x16xbf16>
    %c0_1 = arith.constant 0 : index
    %c0_2 = arith.constant 0 : index
    %2 = vector.load %arg2[%c0_1, %c0_2] : memref<16x32xbf16, #tpu.memory_space<vmem>>, vector<16x32xbf16>
    %cst = arith.constant dense<0.000000e+00> : vector<8x32xf32>
    %3 = tpu.matmul %1, %2, %cst {dimension_numbers = #tpu.dot_dimension_numbers<[1], [0], [0], [1], [0, 0, 1, 1], [], []>} : vector<8x16xbf16>, vector<16x32xbf16>, vector<8x32xf32> -> vector<8x32xf32>
    %c0_3 = arith.constant 0 : index
    %c0_4 = arith.constant 0 : index
    %4 = vector.load %arg3[%c0_3, %c0_4] : memref<1x32xf32, #tpu.memory_space<vmem>>, vector<1x32xf32>
    %5 = vector.broadcast %4 : vector<1x32xf32> to vector<8x32xf32>
    %6 = arith.addf %3, %5 : vector<8x32xf32>
    %cst_5 = arith.constant 0.000000e+00 : f32
    %7 = vector.broadcast %cst_5 : f32 to vector<8x32xf32>
    %8 = arith.maximumf %6, %7 : vector<8x32xf32>
    %9 = arith.truncf %8 : vector<8x32xf32> to vector<8x32xbf16>
    %c0_6 = arith.constant 0 : index
    %c0_7 = arith.constant 0 : index
    %10 = vector.load %arg4[%c0_6, %c0_7] : memref<32x32xbf16, #tpu.memory_space<vmem>>, vector<32x32xbf16>
    %cst_8 = arith.constant dense<0.000000e+00> : vector<8x32xf32>
    %11 = tpu.matmul %9, %10, %cst_8 {dimension_numbers = #tpu.dot_dimension_numbers<[1], [0], [0], [1], [0, 0, 1, 1], [], []>} : vector<8x32xbf16>, vector<32x32xbf16>, vector<8x32xf32> -> vector<8x32xf32>
    %c0_9 = arith.constant 0 : index
    %c0_10 = arith.constant 0 : index
    %12 = vector.load %arg5[%c0_9, %c0_10] : memref<1x32xf32, #tpu.memory_space<vmem>>, vector<1x32xf32>
    %13 = vector.broadcast %12 : vector<1x32xf32> to vector<8x32xf32>
    %14 = arith.addf %11, %13 : vector<8x32xf32>
    %cst_11 = arith.constant 0.000000e+00 : f32
    %15 = vector.broadcast %cst_11 : f32 to vector<8x32xf32>
    %16 = arith.maximumf %14, %15 : vector<8x32xf32>
    %17 = arith.truncf %16 : vector<8x32xf32> to vector<8x32xbf16>
    %c0_12 = arith.constant 0 : index
    %c0_13 = arith.constant 0 : index
    %18 = vector.load %arg6[%c0_12, %c0_13] : memref<32x128xbf16, #tpu.memory_space<vmem>>, vector<32x128xbf16>
    %cst_14 = arith.constant dense<0.000000e+00> : vector<8x128xf32>
    %19 = tpu.matmul %17, %18, %cst_14 {dimension_numbers = #tpu.dot_dimension_numbers<[1], [0], [0], [1], [0, 0, 1, 1], [], []>} : vector<8x32xbf16>, vector<32x128xbf16>, vector<8x128xf32> -> vector<8x128xf32>
    %c0_15 = arith.constant 0 : index
    %c0_16 = arith.constant 0 : index
    %20 = vector.load %arg7[%c0_15, %c0_16] : memref<1x128xf32, #tpu.memory_space<vmem>>, vector<1x128xf32>
    %21 = vector.broadcast %20 : vector<1x128xf32> to vector<8x128xf32>
    %22 = arith.addf %19, %21 : vector<8x128xf32>
    %c0_17 = arith.constant 0 : index
    %c0_18 = arith.constant 0 : index
    %23 = vector.load %arg8[%c0_17, %c0_18] : memref<8x128xf32, #tpu.memory_space<vmem>>, vector<8x128xf32>
    tpu.vector_store %arg8[%c0_17, %c0_18], %22 {strides = array<i32>} : memref<8x128xf32, #tpu.memory_space<vmem>>, vector<8x128xf32>,
    return
  }
  func.func @transform_0(%arg0: i32) -> (i32, i32) {
    %c0_i32 = arith.constant 0 : i32
    %c0_i32_0 = arith.constant 0 : i32
    return %arg0, %c0_i32 : i32, i32
  }
  func.func @transform_1(%arg0: i32) -> (i32, i32) {
    %c0_i32 = arith.constant 0 : i32
    %c0_i32_0 = arith.constant 0 : i32
    %c0_i32_1 = arith.constant 0 : i32
    return %c0_i32, %c0_i32_0 : i32, i32
  }
  func.func @transform_2(%arg0: i32) -> (i32, i32) {
    %c0_i32 = arith.constant 0 : i32
    %c0_i32_0 = arith.constant 0 : i32
    %c0_i32_1 = arith.constant 0 : i32
    return %c0_i32, %c0_i32_0 : i32, i32
  }
  func.func @transform_3(%arg0: i32) -> (i32, i32) {
    %c0_i32 = arith.constant 0 : i32
    %c0_i32_0 = arith.constant 0 : i32
    %c0_i32_1 = arith.constant 0 : i32
    return %c0_i32, %c0_i32_0 : i32, i32
  }
  func.func @transform_4(%arg0: i32) -> (i32, i32) {
    %c0_i32 = arith.constant 0 : i32
    %c0_i32_0 = arith.constant 0 : i32
    %c0_i32_1 = arith.constant 0 : i32
    return %c0_i32, %c0_i32_0 : i32, i32
  }
  func.func @transform_5(%arg0: i32) -> (i32, i32) {
    %c0_i32 = arith.constant 0 : i32
    %c0_i32_0 = arith.constant 0 : i32
    %c0_i32_1 = arith.constant 0 : i32
    return %c0_i32, %c0_i32_0 : i32, i32
  }
  func.func @transform_6(%arg0: i32) -> (i32, i32) {
    %c0_i32 = arith.constant 0 : i32
    %c0_i32_0 = arith.constant 0 : i32
    %c0_i32_1 = arith.constant 0 : i32
    return %c0_i32, %c0_i32_0 : i32, i32
  }
  func.func @transform_7(%arg0: i32) -> (i32, i32) {
    %c0_i32 = arith.constant 0 : i32
    %c0_i32_0 = arith.constant 0 : i32
    return %arg0, %c0_i32 : i32, i32
  }
}

</mosaic_0001>

<bundles_post_ra>
// kernel: tpu_custom_call.1
= control target key start
LH: loop header
LB: loop body
LE: loop exit
PB: predicated region body
PF: predicated region fallthrough
CT: control target
= control target key end

     0   :  { %12 = vsyncpa [#allocation3], 0  ;;  %s454_s0 = inlined_call_operand.hbm [shape: f32[8,16], index: 0, kind: input, shape index: {}]   ;;  %s455_s1 = inlined_call_operand.hbm [shape: bf16[16,32], index: 1, kind: input, shape index: {}]   ;;  %s456_s2 = inlined_call_operand.vmem [shape: f32[1,32], index: 2, kind: input, shape index: {}]   ;;  %s457_s3 = inlined_call_operand.hbm [shape: bf16[32,32], index: 3, kind: input, shape index: {}]   ;;  %s458_s4 = inlined_call_operand.vmem [shape: f32[1,32], index: 4, kind: input, shape index: {}]   ;;  %s459_s5 = inlined_call_operand.hbm [shape: bf16[32,128], index: 5, kind: input, shape index: {}]   ;;  %s460_s6 = inlined_call_operand.vmem [shape: f32[1,128], index: 6, kind: input, shape index: {}]   ;;  %s461_s7 = inlined_call_operand.hbm [shape: f32[8,128], index: 7, kind: output, shape index: {}]  }
   0x1   :  { %13 = vsyncpa [#allocation6], 0 }
   0x2   :  { %14 = vsyncpa [#allocation9], 0  ;;  %s31_s26 = sshll.u32 %s455_s1, 4  ;;  %s32_s26 = int_to_ptr.hbm [resolvable:$true] %s31_s26 }
   0x3   :  { %15 = vsyncpa [#allocation4], 0  ;;  %s383_s27 = smov [#allocation5]   ;;  %s21_s8 = sshll.u32 %s454_s0, 4  ;;  %s22_s8 = int_to_ptr.hbm [resolvable:$true] %s21_s8 }
   0x4   :  { %s33_s28 = sshll.u32 %s383_s27, 4  ;;  %s384_s9 = smov 64   ;;  %s34_s28 = int_to_ptr.vmem [resolvable:$true] %s33_s28 }
   0x5   :  { %s385_s10 = smov 4   ;;  %s386_s11 = smov [#allocation2]  }
   0x6   :  { %39 = dma.hbm_to_vmem [thread:$0]  %s32_s26, 128, %s34_s28, [#allocation6], %s384_s9, %s384_s9, %s385_s10  }
   0x7   :  { %s23_s12 = sshll.u32 %s386_s11, 4  ;;  %s46_s15 = sshll.u32 %s457_s3, 4  ;;  %s24_s12 = int_to_ptr.vmem [resolvable:$true] %s23_s12  ;;  %s47_s15 = int_to_ptr.hbm [resolvable:$true] %s46_s15 }
   0x8   :  { %26 = dma.hbm_to_vmem [thread:$0]  %s22_s8, 128, %s24_s12, [#allocation3]  }
   0x9   :  { %s61_s17 = sshll.u32 %s459_s5, 4  ;;  %s387_s18 = smov [#allocation7]   ;;  %s62_s17 = int_to_ptr.hbm [resolvable:$true] %s61_s17 }
   0xa   :  { %s48_s19 = sshll.u32 %s387_s18, 4  ;;  %s388_s0 = smov [#allocation8]   ;;  %s49_s19 = int_to_ptr.vmem [resolvable:$true] %s48_s19 }
   0xb   :  { %54 = dma.hbm_to_vmem [thread:$0]  %s47_s15, 256, %s49_s19, [#allocation6], %s384_s9, %s384_s9, %s385_s10  }
   0xc   :  { %s63_s20 = sshll.u32 %s388_s0, 4  ;;  %s64_s20 = int_to_ptr.vmem [resolvable:$true] %s63_s20 }
   0xd   :  { %69 = dma.hbm_to_vmem [thread:$0]  %s62_s17, 256, %s64_s20, [#allocation9], %s384_s9, %s384_s9, %s385_s10  }
   0xe   :  { %375 = dma.done.wait [#allocation3], 128  }
   0xf   :  { %376 = vsyncadd [#allocation3], 4294967168 }
  0x10   :  { %377 = dma.done.wait [#allocation6], 384  }
  0x11   :  { %378 = vsyncadd [#allocation6], 4294966912 }
  0x12   :  { %379 = dma.done.wait [#allocation9], 256  }
  0x13   :  { %380 = vsyncadd [#allocation9], 4294967040  ;;  %v240_v0 = vld [vmem:[#allocation5] sm:$0xff]  ;;  %v89_v1 = vld [vmem:[#allocation2] sm:$0xff]  ;;  %vm103_vm0 = vcmask 130048   ;;  %vm142_vm1 = vcmask 261120  }
  0x14   :  { %v90_v2 = vpack.c.bf16 %v89_v1, %v89_v1  ;;  %114 = vmatpush.bf16.msra.mxu0 %v240_v0  ;;  %v242_v3 = vld [vmem:[#allocation7 + $0x8] sm:$0xff]  ;;  %v241_v4 = vld [vmem:[#allocation7] sm:$0xff]  ;;  %v252_v5 = vld [vmem:[%s456_s2] ss:$0 sm:$0xff]  ;;  %s389_s24 = smov [#allocation10]   ;;  %s205_s28 = sshll.u32 %s461_s7, 4  ;;  %s206_s28 = int_to_ptr.hbm [resolvable:$true] %s205_s28 }
  0x15   :  { %152 = vmatpush.bf16.msra.mxu1 %v242_v3  ;;  %v244_v11 = vld [vmem:[#allocation8 + $0x8] sm:$0xff]  ;;  %v243_v12 = vld [vmem:[#allocation8] sm:$0xff]  ;;  %s203_s25 = sshll.u32 %s389_s24, 4  ;;  %s204_s25 = int_to_ptr.vmem [resolvable:$true] %s203_s25 }
  0x16   :  { %190 = vmatpush.bf16.msra.mxu2 %v244_v11  ;;  %v253_v13 = vld [vmem:[%s458_s4] ss:$0 sm:$0xff] }
  0x17   :  { %221 = vmatmul.msk.bf16.vlgmr.msra.gmra.mxu0 %vm103_vm0, %v90_v2  ;;  %v254_v19 = vld [vmem:[%s460_s6] ss:$0 sm:$0xff] }
  0x19   :  { %153 = vmatpush.bf16.msra.mxu1 %v241_v4 }
  0x1a   :  { %191 = vmatpush.bf16.msra.mxu2 %v243_v12 }
  0x94   :  { %v116_v6 = vpop.f32.mrf.mxu0 }
  0x95   :  { %v117_v7 = vadd.f32 %v252_v5, %v116_v6 }
  0x97   :  { %v120_v8 = vmax.f32 %v117_v7, 0.0 }
  0x99   :  { %v121_v9 = vpack.c.bf16 %v120_v8, %v120_v8 }
  0x9b   :  { %230 = vmatmul.msk.bf16.vlgmr.msra.gmra.mxu1 %vm142_vm1, %v121_v9 }
  0x9c   :  { %v118_v10 = vpop.f32.mrf.mxu0 }
 0x118   :  { %v155_v14 = vpop.f32.mrf.mxu1 }
 0x119   :  { %v156_v15 = vadd.f32 %v253_v13, %v155_v14 }
 0x11b   :  { %v159_v16 = vmax.f32 %v156_v15, 0.0 }
 0x11d   :  { %v160_v17 = vpack.c.bf16 %v159_v16, %v159_v16 }
 0x11f   :  { %239 = vmatmul.msk.bf16.vlgmr.msra.gmra.mxu2 %vm142_vm1, %v160_v17 }
 0x120   :  { %v157_v18 = vpop.f32.mrf.mxu1 }
 0x1a2   :  { %v193_v20 = vpop.f32.mrf.mxu2 }
 0x1a3   :  { %v194_v21 = vadd.f32 %v254_v19, %v193_v20 }
 0x1a5   :  { %197 = vst [vmem:[#allocation10] sm:$0xff] %v194_v21 }
 0x1a6   :  { %208 = dma.vmem_to_hbm [thread:$0]  %s204_s25, 128, %s206_s28, [#allocation4]  }
 0x1aa   :  { %v195_v22 = vpop.f32.mrf.mxu2 }
 0x1ab   :  { %381 = dma.done.wait [#allocation4], 128  }
 0x1ac   :  { %382 = vsyncadd [#allocation4], 4294967168 }
 0x1ad   :  { %213 = vsyncpa [#allocation3], 1 }
 0x1ae   :  { %214 = vsyncpa [#allocation6], 1 }
 0x1af   :  { %215 = vsyncpa [#allocation9], 1 }
 0x1b0   :  { %216 = vsyncpa [#allocation4], 1 }

</bundles_post_ra>
